<compile_context>
chip_gen: v6e
topology: v6e:2x2x1
jax: 0.10.0
libtpu: 0.0.40
codegen_flags: <defaults>
</compile_context>

<pallas_src>
import jax
import jax.numpy as jnp
from jax import lax
from jax.experimental import pallas as pl
from jax.experimental.pallas import tpu as pltpu

# --- small config consistent with the module's __init__ ---
VOCAB_SIZE = 100
EMBED_SIZE = 32        # config.embed_size
HIDDEN_SIZE = 32       # config.hidden_size
SEGMENT_SIZE = 2
POSITION_SIZE = 64
PAD_TOKEN_ID = 0
BATCH = 2
SEQ = 8
LN_EPS = 1e-5          # torch.nn.LayerNorm default

# Disjoint offset ranges into the fused table [3V + SEG + POS, H].
TOK_OFF_NXT = 0
TOK_OFF_CUR = VOCAB_SIZE
TOK_OFF_PRV = 2 * VOCAB_SIZE
SEG_OFF = 3 * VOCAB_SIZE
POS_OFF = 3 * VOCAB_SIZE + SEGMENT_SIZE
TABLE_ROWS = 3 * VOCAB_SIZE + SEGMENT_SIZE + POSITION_SIZE   # 366


def _embedding_kernel(ids_ref, table_ref, affine_ref, o_ref):
    # ids: [N, 5] int32 — already offset into disjoint ranges of the fused
    # table: (nxt+0, cur+V, prv+2V, seg+3V, pos+3V+SEG).  Sentinel -1 at
    # sequence boundaries matches no column -> zero row (== F.pad value=0).
    ids = ids_ref[...]
    N = ids.shape[0]
    T = table_ref.shape[0]

    col = lax.broadcasted_iota(jnp.int32, (N, T), 1)
    # Ranges are disjoint, so OR of the 5 one-hots == their sum.
    hot = ((ids[:, 0:1] == col) | (ids[:, 1:2] == col) | (ids[:, 2:3] == col)
           | (ids[:, 3:4] == col) | (ids[:, 4:5] == col)).astype(jnp.float32)

    # Single MXU matmul: token(next/cur/prev)-through-dense + segment + position.
    emb = jnp.dot(hot, table_ref[...], preferred_element_type=jnp.float32)

    # affine: row 0 = dense bias, row 1 = LN gamma, row 2 = LN beta
    emb = emb + affine_ref[0:1, :]

    # LayerNorm over hidden dim (biased variance, eps=1e-5) — use_opt=False path.
    mean = jnp.mean(emb, axis=-1, keepdims=True)
    centered = emb - mean
    var = jnp.mean(centered * centered, axis=-1, keepdims=True)
    normed = centered * lax.rsqrt(var + LN_EPS)

    # TODO(synk): dropout omitted (identity in eval mode; no RNG mask applied here)
    o_ref[...] = (normed * affine_ref[1:2, :] + affine_ref[2:3, :]).astype(o_ref.dtype)


def prepare_embedding_params(params):
    """One-time parameter prep (hoisted out of the forward path).

    Folds the 3E->H dense weight into the token table and concatenates all
    embedding tables into one fused [3V+SEG+POS, H] table.
    """
    tok_table, seg_table, pos_table, dense_w, dense_b, ln_g, ln_b = params
    V, E = tok_table.shape
    fused_table = jnp.concatenate(
        [
            tok_table @ dense_w[0:E, :],          # next-token rows
            tok_table @ dense_w[E:2 * E, :],      # current-token rows
            tok_table @ dense_w[2 * E:3 * E, :],  # previous-token rows
            seg_table,                            # segment rows
            pos_table,                            # position rows
        ],
        axis=0,
    )                                             # [3V+SEG+POS, H]
    affine = jnp.stack([dense_b, ln_g, ln_b], axis=0)   # [3, H]
    return fused_table, affine


def mobile_bert_embedding(token_ids, segment_ids, position_ids, fused_table, affine):
    B, S = token_ids.shape
    T, H = fused_table.shape
    N = B * S

    # --- wrapper-side index plumbing only (tiny int32 ops) ---
    tok = token_ids.astype(jnp.int32)
    sentinel = jnp.full((B, 1), -1, dtype=jnp.int32)
    # Sentinels are inserted AFTER the range offsets so -1 never aliases a row.
    nxt_ids = jnp.concatenate([tok[:, 1:] + TOK_OFF_NXT, sentinel], axis=1)
    cur_ids = tok + TOK_OFF_CUR
    prv_ids = jnp.concatenate([sentinel, tok[:, :-1] + TOK_OFF_PRV], axis=1)
    seg = segment_ids.astype(jnp.int32) + SEG_OFF
    pos = position_ids.astype(jnp.int32) + POS_OFF
    ids = jnp.stack([nxt_ids, cur_ids, prv_ids, seg, pos], axis=-1).reshape(N, 5)

    out = pl.pallas_call(
        _embedding_kernel,
        out_shape=jax.ShapeDtypeStruct((N, H), jnp.float32),
        in_specs=[
            pl.BlockSpec(memory_space=pltpu.MemorySpace.VMEM),   # packed ids   [N, 5]
            pl.BlockSpec(memory_space=pltpu.MemorySpace.VMEM),   # fused table  [T, H]
            pl.BlockSpec(memory_space=pltpu.MemorySpace.VMEM),   # bias/gamma/beta [3, H]
        ],
        out_specs=pl.BlockSpec(memory_space=pltpu.MemorySpace.VMEM),
    )(ids, fused_table, affine)

    return out.reshape(B, S, H)


def reference(token_ids, segment_ids, position_ids, params):
    """Pure-JAX reference mirroring the PyTorch forward."""
    tok_table, seg_table, pos_table, dense_w, dense_b, ln_g, ln_b = params
    tok = tok_table[token_ids]                                       # [B, S, E]
    nxt = jnp.concatenate([tok[:, 1:], jnp.zeros_like(tok[:, :1])], axis=1)
    prv = jnp.concatenate([jnp.zeros_like(tok[:, :1]), tok[:, :-1]], axis=1)
    cat = jnp.concatenate([nxt, tok, prv], axis=2)                   # [B, S, 3E]
    h = cat @ dense_w + dense_b
    emb = h + seg_table[segment_ids] + pos_table[position_ids]
    mean = emb.mean(-1, keepdims=True)
    var = ((emb - mean) ** 2).mean(-1, keepdims=True)
    return (emb - mean) / jnp.sqrt(var + LN_EPS) * ln_g + ln_b


def make_params(key):
    k = jax.random.split(key, 5)
    tok_table = 0.02 * jax.random.normal(k[0], (VOCAB_SIZE, EMBED_SIZE), jnp.float32)
    tok_table = tok_table.at[PAD_TOKEN_ID].set(0.0)                  # padding_idx row zeroed
    seg_table = 0.02 * jax.random.normal(k[1], (SEGMENT_SIZE, HIDDEN_SIZE), jnp.float32)
    pos_table = 0.02 * jax.random.normal(k[2], (POSITION_SIZE, HIDDEN_SIZE), jnp.float32)
    # nn.Linear(3E, H): store already-transposed weight [3E, H] so y = x @ W + b
    lim = 1.0 / (3 * EMBED_SIZE) ** 0.5
    dense_w = jax.random.uniform(k[3], (3 * EMBED_SIZE, HIDDEN_SIZE), jnp.float32, -lim, lim)
    dense_b = jax.random.uniform(k[4], (HIDDEN_SIZE,), jnp.float32, -lim, lim)
    ln_g = jnp.ones((HIDDEN_SIZE,), jnp.float32)
    ln_b = jnp.zeros((HIDDEN_SIZE,), jnp.float32)
    return (tok_table, seg_table, pos_table, dense_w, dense_b, ln_g, ln_b)


if __name__ == "__main__":
    key = jax.random.PRNGKey(0)
    kp, kt, ks = jax.random.split(key, 3)
    params = make_params(kp)

    # One-time prep (hoisted out of the per-call forward path).
    fused_table, affine = prepare_embedding_params(params)
    fused_table = jax.block_until_ready(fused_table)

    token_ids = jax.random.randint(kt, (BATCH, SEQ), 0, VOCAB_SIZE, dtype=jnp.int32)
    segment_ids = jax.random.randint(ks, (BATCH, SEQ), 0, SEGMENT_SIZE, dtype=jnp.int32)
    position_ids = jnp.broadcast_to(jnp.arange(SEQ, dtype=jnp.int32), (BATCH, SEQ))

    out = mobile_bert_embedding(token_ids, segment_ids, position_ids, fused_table, affine)
    out = jax.block_until_ready(out)

    ref = reference(token_ids, segment_ids, position_ids, params)
    assert out.shape == (BATCH, SEQ, HIDDEN_SIZE)
    assert jnp.allclose(out, ref, atol=1e-5, rtol=1e-5), "mismatch vs reference"
    print("KERNEL_OK")
</pallas_src>

<mosaic_0001>
module attributes {stable_mosaic.version = 11 : i64} {
  func.func @_embedding_kernel(%arg0: memref<16x5xi32, #tpu.memory_space<vmem>>, %arg1: memref<366x32xf32, #tpu.memory_space<vmem>>, %arg2: memref<3x32xf32, #tpu.memory_space<vmem>>, %arg3: memref<16x32xf32, #tpu.memory_space<vmem>>) attributes {dimension_semantics = [], scalar_prefetch = 0 : i64, scratch_operands = 0 : i64, tpu.core_type = #tpu.core_type<tc>} {
    %c0 = arith.constant 0 : index
    %c0_0 = arith.constant 0 : index
    %0 = vector.load %arg0[%c0, %c0_0] : memref<16x5xi32, #tpu.memory_space<vmem>>, vector<16x5xi32>
    %1 = tpu.iota {dimensions = array<i32: 1>} : vector<16x366xi32>
    %2 = vector.extract_strided_slice %0 {offsets = [0, 0], sizes = [16, 1], strides = [1, 1]} : vector<16x5xi32> to vector<16x1xi32>
    %3 = vector.broadcast %2 : vector<16x1xi32> to vector<16x366xi32>
    %4 = arith.cmpi eq, %3, %1 : vector<16x366xi32>
    %5 = vector.extract_strided_slice %0 {offsets = [0, 1], sizes = [16, 1], strides = [1, 1]} : vector<16x5xi32> to vector<16x1xi32>
    %6 = vector.broadcast %5 : vector<16x1xi32> to vector<16x366xi32>
    %7 = arith.cmpi eq, %6, %1 : vector<16x366xi32>
    %8 = arith.ori %4, %7 : vector<16x366xi1>
    %9 = vector.extract_strided_slice %0 {offsets = [0, 2], sizes = [16, 1], strides = [1, 1]} : vector<16x5xi32> to vector<16x1xi32>
    %10 = vector.broadcast %9 : vector<16x1xi32> to vector<16x366xi32>
    %11 = arith.cmpi eq, %10, %1 : vector<16x366xi32>
    %12 = arith.ori %8, %11 : vector<16x366xi1>
    %13 = vector.extract_strided_slice %0 {offsets = [0, 3], sizes = [16, 1], strides = [1, 1]} : vector<16x5xi32> to vector<16x1xi32>
    %14 = vector.broadcast %13 : vector<16x1xi32> to vector<16x366xi32>
    %15 = arith.cmpi eq, %14, %1 : vector<16x366xi32>
    %16 = arith.ori %12, %15 : vector<16x366xi1>
    %17 = vector.extract_strided_slice %0 {offsets = [0, 4], sizes = [16, 1], strides = [1, 1]} : vector<16x5xi32> to vector<16x1xi32>
    %18 = vector.broadcast %17 : vector<16x1xi32> to vector<16x366xi32>
    %19 = arith.cmpi eq, %18, %1 : vector<16x366xi32>
    %20 = arith.ori %16, %19 : vector<16x366xi1>
    %21 = arith.extui %20 : vector<16x366xi1> to vector<16x366xi32>
    %22 = arith.sitofp %21 : vector<16x366xi32> to vector<16x366xf32>
    %c0_1 = arith.constant 0 : index
    %c0_2 = arith.constant 0 : index
    %23 = vector.load %arg1[%c0_1, %c0_2] : memref<366x32xf32, #tpu.memory_space<vmem>>, vector<366x32xf32>
    %cst = arith.constant dense<0.000000e+00> : vector<16x32xf32>
    %24 = tpu.matmul %22, %23, %cst {dimension_numbers = #tpu.dot_dimension_numbers<[1], [0], [0], [1], [0, 0, 1, 1], [], []>} : vector<16x366xf32>, vector<366x32xf32>, vector<16x32xf32> -> vector<16x32xf32>
    %c0_3 = arith.constant 0 : index
    %c0_4 = arith.constant 0 : index
    %25 = vector.load %arg2[%c0_3, %c0_4] : memref<3x32xf32, #tpu.memory_space<vmem>>, vector<1x32xf32>
    %26 = vector.broadcast %25 : vector<1x32xf32> to vector<16x32xf32>
    %27 = arith.addf %24, %26 : vector<16x32xf32>
    %cst_5 = arith.constant dense<0.000000e+00> : vector<16xf32>
    %28 = vector.multi_reduction <add>, %27, %cst_5 [1] : vector<16x32xf32> to vector<16xf32>
    %29 = vector.shape_cast %28 : vector<16xf32> to vector<16x1xf32>
    %cst_6 = arith.constant 3.200000e+01 : f32
    %30 = vector.broadcast %cst_6 : f32 to vector<16x1xf32>
    %31 = arith.divf %29, %30 : vector<16x1xf32>
    %32 = vector.broadcast %31 : vector<16x1xf32> to vector<16x32xf32>
    %33 = arith.subf %27, %32 : vector<16x32xf32>
    %34 = arith.mulf %33, %33 : vector<16x32xf32>
    %cst_7 = arith.constant dense<0.000000e+00> : vector<16xf32>
    %35 = vector.multi_reduction <add>, %34, %cst_7 [1] : vector<16x32xf32> to vector<16xf32>
    %36 = vector.shape_cast %35 : vector<16xf32> to vector<16x1xf32>
    %cst_8 = arith.constant 3.200000e+01 : f32
    %37 = vector.broadcast %cst_8 : f32 to vector<16x1xf32>
    %38 = arith.divf %36, %37 : vector<16x1xf32>
    %cst_9 = arith.constant 9.99999974E-6 : f32
    %39 = vector.broadcast %cst_9 : f32 to vector<16x1xf32>
    %40 = arith.addf %38, %39 : vector<16x1xf32>
    %41 = math.rsqrt %40 : vector<16x1xf32>
    %42 = vector.broadcast %41 : vector<16x1xf32> to vector<16x32xf32>
    %43 = arith.mulf %33, %42 : vector<16x32xf32>
    %c1 = arith.constant 1 : index
    %c0_10 = arith.constant 0 : index
    %44 = vector.load %arg2[%c1, %c0_10] : memref<3x32xf32, #tpu.memory_space<vmem>>, vector<1x32xf32>
    %45 = vector.broadcast %44 : vector<1x32xf32> to vector<16x32xf32>
    %46 = arith.mulf %43, %45 : vector<16x32xf32>
    %c2 = arith.constant 2 : index
    %c0_11 = arith.constant 0 : index
    %47 = vector.load %arg2[%c2, %c0_11] : memref<3x32xf32, #tpu.memory_space<vmem>>, vector<1x32xf32>
    %48 = vector.broadcast %47 : vector<1x32xf32> to vector<16x32xf32>
    %49 = arith.addf %46, %48 : vector<16x32xf32>
    %c0_12 = arith.constant 0 : index
    %c0_13 = arith.constant 0 : index
    %50 = vector.load %arg3[%c0_12, %c0_13] : memref<16x32xf32, #tpu.memory_space<vmem>>, vector<16x32xf32>
    tpu.vector_store %arg3[%c0_12, %c0_13], %49 {strides = array<i32>} : memref<16x32xf32, #tpu.memory_space<vmem>>, vector<16x32xf32>,
    return
  }
}

</mosaic_0001>

<bundles_post_ra>
// kernel: tpu_custom_call.1
= control target key start
LH: loop header
LB: loop body
LE: loop exit
PB: predicated region body
PF: predicated region fallthrough
CT: control target
= control target key end

     0   :  { %v531_v1 = vmov 2   ;;  %v532_v2 = vmov 1   ;;  %vm175_vm0 = vcmask 1045504   ;;  %v533_v7 = vmov 3   ;;  %s788_s0 = inlined_call_operand.vmem [shape: s32[16,5], index: 0, kind: input, shape index: {}]   ;;  %s789_s1 = inlined_call_operand.vmem [shape: f32[366,32], index: 1, kind: input, shape index: {}]   ;;  %s790_s2 = inlined_call_operand.vmem [shape: f32[3,32], index: 2, kind: input, shape index: {}]   ;;  %s791_s3 = inlined_call_operand.hbm [shape: f32[16,32], index: 3, kind: output, shape index: {}]  }
   0x1   :  { %v15_v0 = vld [vmem:[%s788_s0] sm:$0xff]  ;;  %497 = vset.pattern.permute.xlu1 %v531_v1  ;;  %495 = vset.pattern.permute.xlu0 %v532_v2  ;;  %v148_v3 = vld [vmem:[%s789_s1 + $0xf8] sm:$0xff]  ;;  %v147_v5 = vld [vmem:[%s789_s1 + $0xf0] sm:$0xff]  ;;  %v534_v8 = vmov 0   ;;  %v535_v16 = vmov 4  }
   0x2   :  { %v132_v4 = vld [vmem:[%s789_s1 + $0x78] sm:$0xff]  ;;  %52 = vperm.xlu1 %497, %v15_v0   ;;  %34 = vperm.xlu0 %495, %v15_v0   ;;  %v131_v6 = vld [vmem:[%s789_s1 + $0x70] sm:$0xff]  ;;  %v146_v9 = vld [vmem:[%s789_s1 + $0xe8] sm:$0xff] }
   0x3   :  { %401 = vmatprep.subr.mxu0 %v148_v3  ;;  %v130_v10 = vld [vmem:[%s789_s1 + $0x68] sm:$0xff]  ;;  %v161_v13 = vld [vmem:[%s789_s1 + $0x160] sm:$0xff]  ;;  %v144_v17 = vld [vmem:[%s789_s1 + $0xd8] sm:$0xff] }
   0x4   :  { %402 = vmatpush3.msra.mxu0 %v132_v4  ;;  %v162_v11 = vld [vmem:[%s789_s1 + $0x168] sm:$0x3f]  ;;  %v145_v14 = vld [vmem:[%s789_s1 + $0xe0] sm:$0xff]  ;;  %v160_v18 = vld [vmem:[%s789_s1 + $0x158] sm:$0xff] }
   0x5   :  { %403 = vmatprep.subr.mxu0 %v147_v5  ;;  %v588_v12 = vld [vmem:[%s788_s0 + $0x8] sm:$0xff]  ;;  %455 = vmatprep.subr.msk.mxu1 %vm175_vm0, %v162_v11  ;;  %v129_v15 = vld [vmem:[%s789_s1 + $0x60] sm:$0xff]  ;;  %v128_v19 = vld [vmem:[%s789_s1 + $0x58] sm:$0xff] }
   0x6   :  { %498 = vset.pattern.permute.xlu1 %v533_v7  ;;  %496 = vset.pattern.permute.xlu0 %v534_v8  ;;  %v143_v20 = vld [vmem:[%s789_s1 + $0xd0] sm:$0xff] }
   0x7   :  { %70 = vperm.xlu1 %498, %v15_v0   ;;  %22 = vperm.xlu0 %496, %v15_v0  }
   0x8   :  { %404 = vmatpush3.msra.mxu0 %v131_v6  ;;  %456 = vmatpush3.msk.msra.mxu1 %vm175_vm0, %v162_v11 }
   0x9   :  { %405 = vmatprep.subr.mxu0 %v146_v9  ;;  %457 = vmatprep.subr.mxu1 %v161_v13 }
   0xa   :  { %406 = vmatpush3.msra.mxu0 %v130_v10  ;;  %458 = vmatpush3.msra.mxu1 %v161_v13 }
   0xb   :  { %499 = vset.pattern.permute.xlu1 %v535_v16  ;;  %25 = vperm.xlu0 %496, %v588_v12  }
   0xc   :  { %88 = vperm.xlu1 %499, %v15_v0   ;;  %407 = vmatprep.subr.mxu0 %v145_v14 }
   0xd   :  { %408 = vmatpush3.msra.mxu0 %v129_v15  ;;  %459 = vmatprep.subr.mxu1 %v160_v18 }
   0xe   :  { %409 = vmatprep.subr.mxu0 %v144_v17 }
   0xf   :  { %8 = vsyncpa [#allocation3], 0  ;;  %502 = vset.pattern.permute.xlu0 %v533_v7  ;;  %410 = vmatpush3.msra.mxu0 %v128_v19  ;;  %v127_v21 = vld [vmem:[%s789_s1 + $0x50] sm:$0xff]  ;;  %v142_v22 = vld [vmem:[%s789_s1 + $0xc8] sm:$0xff]  ;;  %v17_v53 = vlaneseq  ;;  %v793_v61 = vmov 0  ;;  %v536_v63 = vmov 0.0  }
  0x10   :  { %500 = vset.pattern.permute.xlu1 %v532_v2  ;;  %73 = vperm.xlu0 %502, %v588_v12   ;;  %v159_v23 = vld [vmem:[%s789_s1 + $0x150] sm:$0xff]  ;;  %v126_v24 = vld [vmem:[%s789_s1 + $0x48] sm:$0xff]  ;;  %v141_v25 = vld [vmem:[%s789_s1 + $0xc0] sm:$0xff]  ;;  %v796_v7 = vmov 0  ;;  %s537_s29 = smov [#allocation2]  }
  0x11   :  { %37 = vperm.xlu1 %500, %v588_v12   ;;  %411 = vmatprep.subr.mxu0 %v143_v20  ;;  %v125_v26 = vld [vmem:[%s789_s1 + $0x40] sm:$0xff]  ;;  %v140_v27 = vld [vmem:[%s789_s1 + $0xb8] sm:$0xff]  ;;  %v158_v28 = vld [vmem:[%s789_s1 + $0x148] sm:$0xff]  ;;  %v718_v54 = vand.u32 127, %v17_v53  ;;  %s378_s30 = sshll.u32 %s537_s29, 4  ;;  %s379_s30 = int_to_ptr.vmem [resolvable:$true] %s378_s30 }
  0x12   :  { %412 = vmatpush3.msra.mxu0 %v127_v21  ;;  %460 = vmatpush3.msra.mxu1 %v160_v18  ;;  %v124_v29 = vld [vmem:[%s789_s1 + $0x38] sm:$0xff]  ;;  %v139_v30 = vld [vmem:[%s789_s1 + $0xb0] sm:$0xff]  ;;  %v157_v31 = vld [vmem:[%s789_s1 + $0x140] sm:$0xff]  ;;  %s509_s4 = scalar_lea.vmem %s379_s30, 256  ;;  %p514_p1 = scmp.lt.s32.totalorder %s379_s30, %s379_s30 }
  0x13   :  { %413 = vmatprep.subr.mxu0 %v142_v22  ;;  %461 = vmatprep.subr.mxu1 %v159_v23  ;;  %v123_v32 = vld [vmem:[%s789_s1 + $0x30] sm:$0xff]  ;;  %v138_v33 = vld [vmem:[%s789_s1 + $0xa8] sm:$0xff]  ;;  %v137_v35 = vld [vmem:[%s789_s1 + $0xa0] sm:$0xff]  ;;  %v721_v57 = vadd.s32 128, %v718_v54  ;;  %v726_v60 = vadd.s32 256, %v718_v54  ;;  %p510_p0 = scmp.ne.s32.totalorder %s379_s30, %s509_s4  ;;  %p515_p2 = scmp.lt.s32.totalorder %s509_s4, %s509_s4 }
  0x14   :  { %414 = vmatpush3.msra.mxu0 %v126_v24  ;;  %462 = vmatpush3.msra.mxu1 %v159_v23  ;;  %v122_v34 = vld [vmem:[%s789_s1 + $0x28] sm:$0xff]  ;;  %v156_v36 = vld [vmem:[%s789_s1 + $0x138] sm:$0xff]  ;;  %v121_v37 = vld [vmem:[%s789_s1 + $0x20] sm:$0xff] }
  0x15   :  { %501 = vset.pattern.permute.xlu1 %v531_v1  ;;  %415 = vmatprep.subr.mxu0 %v141_v25  ;;  %v136_v38 = vld [vmem:[%s789_s1 + $0x98] sm:$0xff]  ;;  %v155_v39 = vld [vmem:[%s789_s1 + $0x130] sm:$0xff]  ;;  %v154_v42 = vld [vmem:[%s789_s1 + $0x128] sm:$0xff]  ;;  %p516_p3 = por %p515_p2, %p514_p1 }
  0x16   :  { %55 = vperm.xlu1 %501, %v588_v12   ;;  %416 = vmatpush3.msra.mxu0 %v125_v26  ;;  %v120_v40 = vld [vmem:[%s789_s1 + $0x18] sm:$0xff]  ;;  %v135_v41 = vld [vmem:[%s789_s1 + $0x90] sm:$0xff]  ;;  %v134_v44 = vld [vmem:[%s789_s1 + $0x88] sm:$0xff] }
  0x17   :  { %417 = vmatprep.subr.mxu0 %v140_v27  ;;  %463 = vmatprep.subr.mxu1 %v158_v28  ;;  %v119_v43 = vld [vmem:[%s789_s1 + $0x10] sm:$0xff]  ;;  %v153_v45 = vld [vmem:[%s789_s1 + $0x120] sm:$0xff]  ;;  %v118_v46 = vld [vmem:[%s789_s1 + $0x8] sm:$0xff]  ;;  %p517_p4 = pnand %p516_p3, %p510_p0 }
  0x18   :  { %418 = vmatpush3.msra.mxu0 %v124_v29  ;;  %464 = vmatpush3.msra.mxu1 %v158_v28  ;;  %v133_v47 = vld [vmem:[%s789_s1 + $0x80] sm:$0xff]  ;;  %v152_v48 = vld [vmem:[%s789_s1 + $0x118] sm:$0xff]  ;;  %v151_v50 = vld [vmem:[%s789_s1 + $0x110] sm:$0xff] }
  0x19   :  { %419 = vmatprep.subr.mxu0 %v139_v30  ;;  %465 = vmatprep.subr.mxu1 %v157_v31  ;;  %v117_v49 = vld [vmem:[%s789_s1] sm:$0xff]  ;;  %v150_v51 = vld [vmem:[%s789_s1 + $0x108] sm:$0xff] }
  0x1a   :  { %503 = vset.pattern.permute.xlu1 %v535_v16  ;;  %420 = vmatpush3.msra.mxu0 %v123_v32  ;;  %v149_v52 = vld [vmem:[%s789_s1 + $0x100] sm:$0xff] }
  0x1b   :  { %91 = vperm.xlu1 %503, %v588_v12   ;;  %421 = vmatprep.subr.mxu0 %v138_v33  ;;  %v395_v15 = vld [vmem:[%s790_s2] ss:$0 sm:$0xff] }
  0x1c   :  { %422 = vmatpush3.msra.mxu0 %v122_v34  ;;  %466 = vmatpush3.msra.mxu1 %v157_v31 }
  0x1d   :  { %423 = vmatprep.subr.mxu0 %v137_v35  ;;  %467 = vmatprep.subr.mxu1 %v156_v36 }
  0x1e   :  { %424 = vmatpush3.msra.mxu0 %v121_v37  ;;  %468 = vmatpush3.msra.mxu1 %v156_v36 }
  0x1f   :  { %425 = vmatprep.subr.mxu0 %v136_v38  ;;  %469 = vmatprep.subr.mxu1 %v155_v39 }
  0x20   :  { %426 = vmatpush3.msra.mxu0 %v120_v40  ;;  %470 = vmatpush3.msra.mxu1 %v155_v39 }
  0x21   :  { %427 = vmatprep.subr.mxu0 %v135_v41  ;;  %471 = vmatprep.subr.mxu1 %v154_v42 }
  0x22   :  { %428 = vmatpush3.msra.mxu0 %v119_v43  ;;  %472 = vmatpush3.msra.mxu1 %v154_v42 }
  0x23   :  { %429 = vmatprep.subr.mxu0 %v134_v44  ;;  %473 = vmatprep.subr.mxu1 %v153_v45  ;;  %v399_v44 = vld [vmem:[%s790_s2 + $0x1] ss:$0 sm:$0xff] }
  0x24   :  { %430 = vmatpush3.msra.mxu0 %v118_v46  ;;  %474 = vmatpush3.msra.mxu1 %v153_v45  ;;  %v400_v46 = vld [vmem:[%s790_s2 + $0x2] ss:$0 sm:$0xff] }
  0x25   :  { %431 = vmatprep.subr.mxu0 %v133_v47  ;;  %475 = vmatprep.subr.mxu1 %v152_v48 }
  0x26   :  { %432 = vmatpush3.msra.mxu0 %v117_v49  ;;  %476 = vmatpush3.msra.mxu1 %v152_v48 }
  0x27   :  { %477 = vmatprep.subr.mxu1 %v151_v50  ;;  %504 = vset.pattern.permute.xlu0 %v535_v16 }
  0x28   :  { %478 = vmatpush3.msra.mxu1 %v151_v50 }
  0x29   :  { %479 = vmatprep.subr.mxu1 %v150_v51 }
  0x2a   :  { %480 = vmatpush3.msra.mxu1 %v150_v51 }
  0x2b   :  { %481 = vmatprep.subr.mxu1 %v149_v52 }
  0x2c   :  { %482 = vmatpush3.msra.mxu1 %v149_v52 }
  0x7d   :  { %v53_v55 = vpop.permute.xlu1 %52  ;;  %v35_v56 = vpop.permute.xlu0 %34 }
  0x7e   :  { %vm39_vm1 = vcmp.eq.s32.totalorder %v35_v56, %v718_v54  ;;  %vm40_vm2 = vcmp.eq.s32.totalorder %v35_v56, %v721_v57  ;;  %vm58_vm6 = vcmp.eq.s32.totalorder %v53_v55, %v721_v57  ;;  %vm41_vm7 = vcmp.eq.s32.totalorder %v35_v56, %v726_v60 }
  0x7f   :  { %vm59_vm15 = vcmp.eq.s32.totalorder %v53_v55, %v726_v60 }
  0x82   :  { %v71_v58 = vpop.permute.xlu1 %70  ;;  %v23_v59 = vpop.permute.xlu0 %22 }
  0x83   :  { %vm27_vm3 = vcmp.eq.s32.totalorder %v23_v59, %v718_v54  ;;  %vm28_vm4 = vcmp.eq.s32.totalorder %v23_v59, %v721_v57  ;;  %vm29_vm8 = vcmp.eq.s32.totalorder %v23_v59, %v726_v60  ;;  %vm76_vm11 = vcmp.eq.s32.totalorder %v71_v58, %v721_v57 }
  0x84   :  { %vm730_vm5 = vmor %vm27_vm3, %vm39_vm1 }
  0x85   :  { %v794_v61 = vsel %vm730_vm5, 4294967295, %v793_v61  ;;  %vm46_vm9 = vmor %vm28_vm4, %vm40_vm2  ;;  %vm77_vm5 = vcmp.eq.s32.totalorder %v71_v58, %v726_v60  ;;  %vm792_vm4 = vcmask 900096  }
  0x86   :  { %vm64_vm10 = vmor %vm46_vm9, %vm58_vm6  ;;  %v26_v1 = vpop.permute.xlu0 %25  ;;  %vm57_vm6 = vcmp.eq.s32.totalorder %v53_v55, %v718_v54 }
  0x87   :  { %v89_v62 = vpop.permute.xlu1 %88  ;;  %vm82_vm12 = vmor %vm64_vm10, %vm76_vm11  ;;  %vm795_vm11 = vnez %v794_v61 }
  0x88   :  { %vm94_vm13 = vcmp.eq.s32.totalorder %v89_v62, %v721_v57  ;;  %vm47_vm14 = vmor %vm29_vm8, %vm41_vm7  ;;  %vm95_vm1 = vcmp.eq.s32.totalorder %v89_v62, %v726_v60  ;;  %vm93_vm9 = vcmp.eq.s32.totalorder %v89_v62, %v718_v54  ;;  %vm75_vm7 = vcmp.eq.s32.totalorder %v71_v58, %v718_v54 }
  0x89   :  { %vm100_vm0 = vmor %vm82_vm12, %vm94_vm13  ;;  %vm30_vm13 = vcmp.eq.s32.totalorder %v26_v1, %v718_v54 }
  0x8a   :  { %v390_v0 = vsel %vm100_vm0, 1.0, %v536_v63  ;;  %vm65_vm3 = vmor %vm47_vm14, %vm59_vm15  ;;  %vm31_vm15 = vcmp.eq.s32.totalorder %v26_v1, %v721_v57 }
  0x8b   :  { %243 = vmatprep.mubr.f32.mxu0 %v390_v0  ;;  %vm83_vm2 = vmor %vm65_vm3, %vm77_vm5  ;;  %vm32_vm3 = vcmp.eq.s32.totalorder %v26_v1, %v726_v60  ;;  %v74_v5 = vpop.permute.xlu0 %73 }
  0x8c   :  { %vm101_vm10 = vmor %vm83_vm2, %vm95_vm1  ;;  %v38_v2 = vpop.permute.xlu1 %37 }
  0x8d   :  { %v391_v3 = vsel %vm101_vm10, 1.0, %v536_v63  ;;  %vm42_vm8 = vcmp.eq.s32.totalorder %v38_v2, %v718_v54  ;;  %vm63_vm12 = vmor %vm795_vm11, %vm57_vm6  ;;  %vm43_vm5 = vcmp.eq.s32.totalorder %v38_v2, %v721_v57  ;;  %vm44_vm0 = vcmp.eq.s32.totalorder %v38_v2, %v726_v60 }
  0x8e   :  { %483 = vmatprep.mubr.msk.f32.mxu1 %vm792_vm4, %v391_v3  ;;  %vm81_vm14 = vmor %vm63_vm12, %vm75_vm7 }
  0x8f   :  { %vm99_vm1 = vmor %vm81_vm14, %vm93_vm9  ;;  %vm80_vm9 = vcmp.eq.s32.totalorder %v74_v5, %v726_v60 }
  0x90   :  { %v389_v4 = vsel %vm99_vm1, 1.0, %v536_v63  ;;  %vm48_vm2 = vmor %vm30_vm13, %vm42_vm8  ;;  %vm79_vm8 = vcmp.eq.s32.totalorder %v74_v5, %v721_v57 }
  0x91   :  { %244 = vmatmul.mubr.f32.vlgmr.msra.gmra.mxu0 %v389_v4  ;;  %vm49_vm10 = vmor %vm31_vm15, %vm43_vm5  ;;  %v56_v6 = vpop.permute.xlu1 %55  ;;  %vm78_vm5 = vcmp.eq.s32.totalorder %v74_v5, %v718_v54 }
  0x92   :  { %vm50_vm6 = vmor %vm32_vm3, %vm44_vm0  ;;  %vm60_vm11 = vcmp.eq.s32.totalorder %v56_v6, %v718_v54  ;;  %vm61_vm4 = vcmp.eq.s32.totalorder %v56_v6, %v721_v57  ;;  %vm62_vm7 = vcmp.eq.s32.totalorder %v56_v6, %v726_v60 }
  0x93   :  { %vm757_vm12 = vmor %vm48_vm2, %vm60_vm11 }
  0x94   :  { %v797_v7 = vsel %vm757_vm12, 4294967295, %v796_v7  ;;  %vm67_vm14 = vmor %vm49_vm10, %vm61_vm4 }
  0x95   :  { %vm68_vm13 = vmor %vm50_vm6, %vm62_vm7  ;;  %vm798_vm4 = vnez %v797_v7  ;;  %vm799_vm6 = vcmask 900096  }
  0x96   :  { %vm86_vm1 = vmor %vm68_vm13, %vm80_vm9  ;;  %v92_v8 = vpop.permute.xlu1 %91 }
  0x97   :  { %vm97_vm15 = vcmp.eq.s32.totalorder %v92_v8, %v721_v57  ;;  %vm98_vm0 = vcmp.eq.s32.totalorder %v92_v8, %v726_v60  ;;  %vm85_vm3 = vmor %vm67_vm14, %vm79_vm8  ;;  %vm96_vm2 = vcmp.eq.s32.totalorder %v92_v8, %v718_v54 }
  0x98   :  { %vm103_vm11 = vmor %vm85_vm3, %vm97_vm15 }
  0x99   :  { %v393_v9 = vsel %vm103_vm11, 1.0, %v536_v63  ;;  %vm104_vm12 = vmor %vm86_vm1, %vm98_vm0 }
  0x9a   :  { %248 = vmatprep.mubr.f32.mxu0 %v393_v9  ;;  %v394_v10 = vsel %vm104_vm12, 1.0, %v536_v63  ;;  %vm84_vm10 = vmor %vm798_vm4, %vm78_vm5  ;;  %vm329_vm12 = vcmask 261120  }
  0x9b   :  { %484 = vmatmul.mubr.msk.f32.vlgmr.msra.gmra.mxu1 %vm799_vm6, %v394_v10  ;;  %vm102_vm7 = vmor %vm84_vm10, %vm96_vm2 }
  0x9c   :  { %v392_v11 = vsel %vm102_vm7, 1.0, %v536_v63 }
  0x9d   :  { %249 = vmatmul.mubr.f32.gmra.mxu0 %v392_v11 }
 0x151   :  { %v433_v12 = vpop.f32.mrf.mxu0 }
 0x153   :  { %v434_v13 = vpop.f32.mrf.mxu0 }
 0x154   :  { %v435_v14 = vadd.f32 %v434_v13, %v433_v12 }
 0x156   :  { %v246_v17 = vadd.f32 %v435_v14, %v395_v15 }
 0x15b   :  { %v485_v16 = vpop.f32.mrf.mxu1 }
 0x15d   :  { %v436_v18 = vpop.f32.mrf.mxu0  ;;  %v320_v19 = vpop.f32.mrf.mxu1 }
 0x15e   :  { %v321_v20 = vadd.f32 %v320_v19, %v246_v17 }
 0x15f   :  { %v437_v21 = vpop.f32.mrf.mxu0 }
 0x160   :  { %v438_v22 = vadd.f32 %v437_v21, %v436_v18  ;;  %v330_v23 = vsel %vm329_vm12, %v321_v20, 0.0 }
 0x161   :  { %331 = vadd.xlane.f32.xlu1 %v330_v23 }
 0x162   :  { %v251_v24 = vadd.f32 %v438_v22, %v395_v15 }
 0x164   :  { %v326_v25 = vadd.f32 %v485_v16, %v251_v24 }
 0x166   :  { %v333_v26 = vsel %vm329_vm12, %v326_v25, 0.0 }
 0x167   :  { %334 = vadd.xlane.f32.xlu0 %v333_v26 }
 0x1ea   :  { %v332_v27 = vpop.xlane.xlu1 %331 }
 0x1eb   :  { %v337_v28 = vmul.f32 0.03125, %v332_v27 }
 0x1ed   :  { %v339_v29 = vsub.f32 %v321_v20, %v337_v28 }
 0x1ef   :  { %v341_v30 = vmul.f32 %v339_v29, %v339_v29 }
 0x1f0   :  { %v335_v31 = vpop.xlane.xlu0 %334 }
 0x1f1   :  { %v338_v32 = vmul.f32 0.03125, %v335_v31  ;;  %v343_v33 = vsel %vm329_vm12, %v341_v30, 0.0 }
 0x1f2   :  { %344 = vadd.xlane.f32.xlu0 %v343_v33 }
 0x1f3   :  { %v340_v34 = vsub.f32 %v326_v25, %v338_v32 }
 0x1f5   :  { %v342_v35 = vmul.f32 %v340_v34, %v340_v34 }
 0x1f7   :  { %v346_v36 = vsel %vm329_vm12, %v342_v35, 0.0 }
 0x1f8   :  { %347 = vadd.xlane.f32.xlu1 %v346_v36 }
 0x27b   :  { %v345_v37 = vpop.xlane.xlu0 %344 }
 0x27c   :  { %v349_v38 = vmul.f32 0.03125, %v345_v37 }
 0x27e   :  { %v351_v39 = vadd.f32 1e-05, %v349_v38 }
 0x280   :  { %505 = vrsqrt.f32 %v351_v39 }
 0x281   :  { %v348_v40 = vpop.xlane.xlu1 %347 }
 0x282   :  { %v350_v41 = vmul.f32 0.03125, %v348_v40 }
 0x284   :  { %v352_v42 = vadd.f32 1e-05, %v350_v41 }
 0x286   :  { %507 = vrsqrt.f32 %v352_v42 }
 0x28d   :  { %v506_v43 = vpop.eup %505 }
 0x28e   :  { %v355_v45 = vmul.f32 %v506_v43, %v339_v29 }
 0x290   :  { %v362_v47 = vmul.f32 %v399_v44, %v355_v45 }
 0x292   :  { %v369_v48 = vadd.f32 %v400_v46, %v362_v47 }
 0x293   :  { %v508_v49 = vpop.eup %507 }
 0x294   :  { %v356_v50 = vmul.f32 %v508_v49, %v340_v34  ;;  %371 = vst.msk [vmem:[#allocation2] sm:$0xff] %vm329_vm12, %v369_v48 }
 0x296   :  { %v363_v51 = vmul.f32 %v399_v44, %v356_v50 }
 0x298   :  { %v370_v52 = vadd.f32 %v400_v46, %v363_v51 }
 0x29a   :  { %372 = vst.msk [vmem:[#allocation2 + $0x8] sm:$0xff] %vm329_vm12, %v370_v52 }
 0x29b   :  { %520 = shalt.err (!%p517_p4)
}
 0x29c   :  { %s538_s2 = smov 128   ;;  %s539_s5 = smov 8  }
 0x29d   :  { %384 = dma.vmem_to_hbm [thread:$0]  %s379_s30, 256, %s791_s3, [#allocation3], %s538_s2, %s538_s2, %s539_s5  }
 0x29e   :  { %529 = dma.done.wait [#allocation3], 256  }
 0x29f   :  { %530 = vsyncadd [#allocation3], 4294967040 }
 0x2a0   :  { %388 = vsyncpa [#allocation3], 1 }

</bundles_post_ra>
